<compile_context>
chip_gen: v7x
topology: tpu7x:2x2x1
jax: 0.10.0
libtpu: 0.0.40
codegen_flags: <defaults>
</compile_context>

<pallas_src>
import functools
import math

import jax
import jax.numpy as jnp
from jax import lax
from jax.experimental import pallas as pl
from jax.experimental.pallas import tpu as pltpu


def adapter_kernel(x_ref, g_ref, b_ref, wd_ref, bd_ref, wu_ref, bu_ref, o_ref,
                   *, eps, bf16_matmul):
    # ---- LayerNorm in fp32 (NonHalfLayerNorm: compute f32, cast back) ----
    x32 = x_ref[...].astype(jnp.float32)
    mean = jnp.mean(x32, axis=-1, keepdims=True)
    var = jnp.mean((x32 - mean) ** 2, axis=-1, keepdims=True)   # two-pass, stable
    xn = (x32 - mean) * lax.rsqrt(var + eps)
    xn = xn * g_ref[...].astype(jnp.float32) + b_ref[...].astype(jnp.float32)
    xn = xn.astype(x_ref.dtype)

    mm_dtype = jnp.bfloat16 if bf16_matmul else x_ref.dtype

    # ---- down projection + ReLU (bottleneck padded to lane-dense width) ----
    h = jnp.dot(xn.astype(mm_dtype), wd_ref[...].astype(mm_dtype),
                preferred_element_type=jnp.float32)
    h = jnp.maximum(h + bd_ref[...].astype(jnp.float32), 0.0)

    # ---- up projection ----
    y = jnp.dot(h.astype(mm_dtype), wu_ref[...].astype(mm_dtype),
                preferred_element_type=jnp.float32)
    y = y + bu_ref[...].astype(jnp.float32)
    o_ref[...] = y.astype(o_ref.dtype)


def _vmem_capacity_bytes(default=64 << 20):
    """Per-core VMEM; conservative (v7x-sized) default on any failure."""
    try:
        cap = int(pltpu.get_tpu_info().vmem_capacity_bytes)
        return min(max(cap, 64 << 20), 128 << 20)
    except Exception:
        return default


def _plan_tiling(n_rows, in_dim, bottle_pad, out_dim, x_dtype, w_dtype,
                 max_tile=512, steps_target=8):
    """Pick the row tile and a matching scoped-VMEM request."""
    itemsize = jnp.dtype(x_dtype).itemsize
    w_itemsize = jnp.dtype(w_dtype).itemsize
    row_align = 8 * max(1, 4 // itemsize)          # 8 (f32), 16 (bf16), 32 (i8)

    cap = _vmem_capacity_bytes()
    budget = cap - (16 << 20)                      # headroom for internal scratch

    # Resident params, single-buffered (pl.Buffered(1)) -> no 2x factor.
    weight_bytes = w_itemsize * (in_dim * bottle_pad + bottle_pad * out_dim
                                 + bottle_pad + out_dim)
    weight_bytes += 4 * 2 * in_dim                 # fp32 gamma / beta

    # Per-row working set: double-buffered x/out tiles plus all fp32
    # intermediates that are simultaneously live in the body.
    per_row = (2 * itemsize * in_dim               # x tile (double-buffered)
               + 2 * itemsize * out_dim            # out tile (double-buffered)
               + 4 * 2 * in_dim                    # x32 and xn (fp32)
               + itemsize * in_dim                 # xn cast to x dtype
               + 4 * bottle_pad                    # h (fp32)
               + itemsize * bottle_pad             # h cast
               + 4 * out_dim)                      # y (fp32)

    avail = max(budget - weight_bytes, per_row * row_align)
    tile = max(row_align, min(int(avail // per_row), max_tile))
    tile = (tile // row_align) * row_align

    # Keep >= steps_target grid steps (>= ~4 per TensorCore on v7x) so the
    # software pipeline can overlap input DMA / output writeback with compute.
    steps_cap = -(-n_rows // steps_target)
    steps_cap = -(-steps_cap // row_align) * row_align
    tile = max(row_align, min(tile, steps_cap))

    # Request only what the working set needs (+25% slack), not 3/4 of VMEM.
    working_set = weight_bytes + tile * per_row
    vmem_limit = int(working_set * 1.25) + (4 << 20)
    vmem_limit = max(32 << 20, min(vmem_limit, budget))
    return tile, int(vmem_limit)


def adapter_forward(x, params, *, eps=1e-5, tile_m=None, bf16_matmul=False):
    """x: (..., in_dim).  params: dict of weights (see init_adapter_params)."""
    in_dim = x.shape[-1]
    bottle = params["wd"].shape[1]
    out_dim = params["wu"].shape[1]
    lead = x.shape[:-1]
    n = math.prod(lead) if lead else 1
    x2 = x.reshape(n, in_dim)

    # Matmul weights/biases in activation dtype; gamma/beta stay fp32.
    wd = params["wd"].astype(x.dtype)
    bd = params["bd"].astype(x.dtype)
    wu = params["wu"].astype(x.dtype)
    bu = params["bu"].astype(x.dtype)

    # Lane-dense bottleneck: pad (tiny weights only) to a multiple of 128 —
    # and no further.  Zero-padded columns/rows are exact no-ops.
    bottle_pad = max(128, pl.cdiv(bottle, 128) * 128)
    if bottle_pad != bottle:
        pad = bottle_pad - bottle
        wd = jnp.pad(wd, ((0, 0), (0, pad)))
        bd = jnp.pad(bd, ((0, 0), (0, pad)))
        wu = jnp.pad(wu, ((0, pad), (0, 0)))

    auto_tile, vmem_limit = _plan_tiling(n, in_dim, bottle_pad, out_dim,
                                         x.dtype, wd.dtype)
    if tile_m is None:
        tile_m = auto_tile

    grid = (pl.cdiv(n, tile_m),)   # ragged last block masked by Pallas

    def const_spec(shape):
        # Constant block index -> never re-DMA'd; single-buffer to save VMEM.
        return pl.BlockSpec(shape, lambda i: (0, 0),
                            pipeline_mode=pl.Buffered(1))

    out = pl.pallas_call(
        functools.partial(adapter_kernel, eps=eps, bf16_matmul=bf16_matmul),
        out_shape=jax.ShapeDtypeStruct((n, out_dim), x.dtype),
        grid_spec=pltpu.PrefetchScalarGridSpec(
            num_scalar_prefetch=0,
            grid=grid,
            in_specs=[
                pl.BlockSpec((tile_m, in_dim), lambda i: (i, 0)),   # x rows
                const_spec((1, in_dim)),                            # gamma (f32)
                const_spec((1, in_dim)),                            # beta  (f32)
                const_spec((in_dim, bottle_pad)),                   # down W
                const_spec((1, bottle_pad)),                        # down b
                const_spec((bottle_pad, out_dim)),                  # up W
                const_spec((1, out_dim)),                           # up b
            ],
            out_specs=pl.BlockSpec((tile_m, out_dim), lambda i: (i, 0)),
        ),
        # Row axis is embarrassingly parallel; "parallel" lets multi-TC chips
        # (v7x) shard it across cores (no-op on single-TC v5e/v6e).
        compiler_params=pltpu.CompilerParams(
            dimension_semantics=("parallel",),
            vmem_limit_bytes=vmem_limit,
        ),
    )(x2, params["norm_w"], params["norm_b"], wd, bd, wu, bu)

    return out.reshape(*lead, out_dim)


def init_adapter_params(key, in_dim, bottle_dim, out_dim=None,
                        dtype=jnp.float32):
    """Parameter init mirroring Adapter.__init__ shapes.

    Note: the PyTorch module zero-inits `up` (output would be identically
    zero); here `up` gets a small random init so the full compute path is
    exercised (same shapes / semantics).
    """
    out_dim = in_dim if out_dim is None else out_dim
    k_down, k_up = jax.random.split(key)
    # kaiming_uniform_(a=sqrt(5)) on (bottle, in) -> bound = 1/sqrt(in_dim)
    bound = 1.0 / math.sqrt(in_dim)
    wd = jax.random.uniform(k_down, (in_dim, bottle_dim), dtype,
                            minval=-bound, maxval=bound)   # stored as x @ wd
    wu = (0.02 * jax.random.normal(k_up, (bottle_dim, out_dim))).astype(dtype)
    return {
        "norm_w": jnp.ones((1, in_dim), jnp.float32),
        "norm_b": jnp.zeros((1, in_dim), jnp.float32),
        "wd": wd,
        "bd": jnp.zeros((1, bottle_dim), dtype),
        "wu": wu,
        "bu": jnp.zeros((1, out_dim), dtype),
    }


def adapter_reference(x, params, eps=1e-5):
    x32 = x.astype(jnp.float32)
    mean = jnp.mean(x32, axis=-1, keepdims=True)
    var = jnp.mean((x32 - mean) ** 2, axis=-1, keepdims=True)
    xn = (x32 - mean) / jnp.sqrt(var + eps)
    xn = xn * params["norm_w"][0] + params["norm_b"][0]
    xn = xn.astype(x.dtype)
    h = jnp.maximum(xn.astype(jnp.float32) @ params["wd"].astype(jnp.float32)
                    + params["bd"][0].astype(jnp.float32), 0.0)
    y = h @ params["wu"].astype(jnp.float32) + params["bu"][0].astype(jnp.float32)
    return y.astype(x.dtype)


if __name__ == "__main__":
    key = jax.random.PRNGKey(0)
    k1, k2, k3, k4 = jax.random.split(key, 4)

    # Case 1: small fp32 shapes, row count divides the tile evenly.
    B, S, in_dim, bottle_dim = 2, 8, 32, 8
    x = jax.random.normal(k1, (B, S, in_dim), jnp.float32)
    params = init_adapter_params(k2, in_dim, bottle_dim)
    y = jax.block_until_ready(adapter_forward(x, params))
    y_ref = adapter_reference(x, params)
    assert y.shape == (B, S, in_dim), y.shape
    assert jnp.allclose(y, y_ref, atol=2e-5, rtol=2e-5), float(
        jnp.max(jnp.abs(y - y_ref)))

    # Case 2: ragged row count (3*7=21 rows) -> exercises the masked edge block
    # (no host-side padding / slicing copies).
    B2, S2, in_dim2, bottle2 = 3, 7, 64, 16
    x2 = jax.random.normal(k3, (B2, S2, in_dim2), jnp.float32)
    params2 = init_adapter_params(k4, in_dim2, bottle2)
    y2 = jax.block_until_ready(adapter_forward(x2, params2))
    y2_ref = adapter_reference(x2, params2)
    assert y2.shape == (B2, S2, in_dim2), y2.shape
    assert jnp.allclose(y2, y2_ref, atol=2e-5, rtol=2e-5), float(
        jnp.max(jnp.abs(y2 - y2_ref)))

    # Case 3: bf16 activations (weights cast to bf16 in the wrapper) with the
    # bf16 MXU path — loose tolerance against the fp32-ish reference.
    xb = jax.random.normal(k1, (B, S, in_dim), jnp.float32).astype(jnp.bfloat16)
    yb = jax.block_until_ready(adapter_forward(xb, params, bf16_matmul=True))
    yb_ref = adapter_reference(xb, params)
    assert yb.shape == (B, S, in_dim), yb.shape
    assert jnp.allclose(yb.astype(jnp.float32), yb_ref.astype(jnp.float32),
                        atol=5e-2, rtol=5e-2), float(
        jnp.max(jnp.abs(yb.astype(jnp.float32) - yb_ref.astype(jnp.float32))))

    print("KERNEL_OK")
</pallas_src>

<mosaic_0001>
module attributes {stable_mosaic.version = 11 : i64} {
  func.func @adapter_kernel(%arg0: i32, %arg1: memref<8x32xf32, #tpu.memory_space<vmem>>, %arg2: memref<1x32xf32, #tpu.memory_space<vmem>>, %arg3: memref<1x32xf32, #tpu.memory_space<vmem>>, %arg4: memref<32x128xf32, #tpu.memory_space<vmem>>, %arg5: memref<1x128xf32, #tpu.memory_space<vmem>>, %arg6: memref<128x32xf32, #tpu.memory_space<vmem>>, %arg7: memref<1x32xf32, #tpu.memory_space<vmem>>, %arg8: memref<8x32xf32, #tpu.memory_space<vmem>>) attributes {dimension_semantics = [#tpu.dimension_semantics<parallel>], iteration_bounds = array<i64: 2>, scalar_prefetch = 0 : i64, scratch_operands = 0 : i64, tpu.core_type = #tpu.core_type<tc>, window_params = [{transform_indices = @transform_0, window_bounds = array<i64: 8, 32>}, {pipeline_mode = #tpu.pipeline_mode<synchronous>, transform_indices = @transform_1, window_bounds = array<i64: 1, 32>}, {pipeline_mode = #tpu.pipeline_mode<synchronous>, transform_indices = @transform_2, window_bounds = array<i64: 1, 32>}, {pipeline_mode = #tpu.pipeline_mode<synchronous>, transform_indices = @transform_3, window_bounds = array<i64: 32, 128>}, {pipeline_mode = #tpu.pipeline_mode<synchronous>, transform_indices = @transform_4, window_bounds = array<i64: 1, 128>}, {pipeline_mode = #tpu.pipeline_mode<synchronous>, transform_indices = @transform_5, window_bounds = array<i64: 128, 32>}, {pipeline_mode = #tpu.pipeline_mode<synchronous>, transform_indices = @transform_6, window_bounds = array<i64: 1, 32>}, {transform_indices = @transform_7, window_bounds = array<i64: 8, 32>}]} {
    %c0 = arith.constant 0 : index
    %c0_0 = arith.constant 0 : index
    %0 = vector.load %arg1[%c0, %c0_0] : memref<8x32xf32, #tpu.memory_space<vmem>>, vector<8x32xf32>
    %cst = arith.constant dense<0.000000e+00> : vector<8xf32>
    %1 = vector.multi_reduction <add>, %0, %cst [1] : vector<8x32xf32> to vector<8xf32>
    %2 = vector.shape_cast %1 : vector<8xf32> to vector<8x1xf32>
    %cst_1 = arith.constant 3.200000e+01 : f32
    %3 = vector.broadcast %cst_1 : f32 to vector<8x1xf32>
    %4 = arith.divf %2, %3 : vector<8x1xf32>
    %5 = vector.broadcast %4 : vector<8x1xf32> to vector<8x32xf32>
    %6 = arith.subf %0, %5 : vector<8x32xf32>
    %7 = arith.mulf %6, %6 : vector<8x32xf32>
    %cst_2 = arith.constant dense<0.000000e+00> : vector<8xf32>
    %8 = vector.multi_reduction <add>, %7, %cst_2 [1] : vector<8x32xf32> to vector<8xf32>
    %9 = vector.shape_cast %8 : vector<8xf32> to vector<8x1xf32>
    %cst_3 = arith.constant 3.200000e+01 : f32
    %10 = vector.broadcast %cst_3 : f32 to vector<8x1xf32>
    %11 = arith.divf %9, %10 : vector<8x1xf32>
    %12 = vector.broadcast %4 : vector<8x1xf32> to vector<8x32xf32>
    %13 = arith.subf %0, %12 : vector<8x32xf32>
    %cst_4 = arith.constant 9.99999974E-6 : f32
    %14 = vector.broadcast %cst_4 : f32 to vector<8x1xf32>
    %15 = arith.addf %11, %14 : vector<8x1xf32>
    %16 = math.rsqrt %15 : vector<8x1xf32>
    %17 = vector.broadcast %16 : vector<8x1xf32> to vector<8x32xf32>
    %18 = arith.mulf %13, %17 : vector<8x32xf32>
    %c0_5 = arith.constant 0 : index
    %c0_6 = arith.constant 0 : index
    %19 = vector.load %arg2[%c0_5, %c0_6] : memref<1x32xf32, #tpu.memory_space<vmem>>, vector<1x32xf32>
    %20 = vector.broadcast %19 : vector<1x32xf32> to vector<8x32xf32>
    %21 = arith.mulf %18, %20 : vector<8x32xf32>
    %c0_7 = arith.constant 0 : index
    %c0_8 = arith.constant 0 : index
    %22 = vector.load %arg3[%c0_7, %c0_8] : memref<1x32xf32, #tpu.memory_space<vmem>>, vector<1x32xf32>
    %23 = vector.broadcast %22 : vector<1x32xf32> to vector<8x32xf32>
    %24 = arith.addf %21, %23 : vector<8x32xf32>
    %c0_9 = arith.constant 0 : index
    %c0_10 = arith.constant 0 : index
    %25 = vector.load %arg4[%c0_9, %c0_10] : memref<32x128xf32, #tpu.memory_space<vmem>>, vector<32x128xf32>
    %cst_11 = arith.constant dense<0.000000e+00> : vector<8x128xf32>
    %26 = tpu.matmul %24, %25, %cst_11 {dimension_numbers = #tpu.dot_dimension_numbers<[1], [0], [0], [1], [0, 0, 1, 1], [], []>} : vector<8x32xf32>, vector<32x128xf32>, vector<8x128xf32> -> vector<8x128xf32>
    %c0_12 = arith.constant 0 : index
    %c0_13 = arith.constant 0 : index
    %27 = vector.load %arg5[%c0_12, %c0_13] : memref<1x128xf32, #tpu.memory_space<vmem>>, vector<1x128xf32>
    %28 = vector.broadcast %27 : vector<1x128xf32> to vector<8x128xf32>
    %29 = arith.addf %26, %28 : vector<8x128xf32>
    %cst_14 = arith.constant 0.000000e+00 : f32
    %30 = vector.broadcast %cst_14 : f32 to vector<8x128xf32>
    %31 = arith.maximumf %29, %30 : vector<8x128xf32>
    %c0_15 = arith.constant 0 : index
    %c0_16 = arith.constant 0 : index
    %32 = vector.load %arg6[%c0_15, %c0_16] : memref<128x32xf32, #tpu.memory_space<vmem>>, vector<128x32xf32>
    %cst_17 = arith.constant dense<0.000000e+00> : vector<8x32xf32>
    %33 = tpu.matmul %31, %32, %cst_17 {dimension_numbers = #tpu.dot_dimension_numbers<[1], [0], [0], [1], [0, 0, 1, 1], [], []>} : vector<8x128xf32>, vector<128x32xf32>, vector<8x32xf32> -> vector<8x32xf32>
    %c0_18 = arith.constant 0 : index
    %c0_19 = arith.constant 0 : index
    %34 = vector.load %arg7[%c0_18, %c0_19] : memref<1x32xf32, #tpu.memory_space<vmem>>, vector<1x32xf32>
    %35 = vector.broadcast %34 : vector<1x32xf32> to vector<8x32xf32>
    %36 = arith.addf %33, %35 : vector<8x32xf32>
    %c0_20 = arith.constant 0 : index
    %c0_21 = arith.constant 0 : index
    %37 = vector.load %arg8[%c0_20, %c0_21] : memref<8x32xf32, #tpu.memory_space<vmem>>, vector<8x32xf32>
    tpu.vector_store %arg8[%c0_20, %c0_21], %36 {strides = array<i32>} : memref<8x32xf32, #tpu.memory_space<vmem>>, vector<8x32xf32>,
    return
  }
  func.func @transform_0(%arg0: i32) -> (i32, i32) {
    %c0_i32 = arith.constant 0 : i32
    %c0_i32_0 = arith.constant 0 : i32
    return %arg0, %c0_i32 : i32, i32
  }
  func.func @transform_1(%arg0: i32) -> (i32, i32) {
    %c0_i32 = arith.constant 0 : i32
    %c0_i32_0 = arith.constant 0 : i32
    %c0_i32_1 = arith.constant 0 : i32
    return %c0_i32, %c0_i32_0 : i32, i32
  }
  func.func @transform_2(%arg0: i32) -> (i32, i32) {
    %c0_i32 = arith.constant 0 : i32
    %c0_i32_0 = arith.constant 0 : i32
    %c0_i32_1 = arith.constant 0 : i32
    return %c0_i32, %c0_i32_0 : i32, i32
  }
  func.func @transform_3(%arg0: i32) -> (i32, i32) {
    %c0_i32 = arith.constant 0 : i32
    %c0_i32_0 = arith.constant 0 : i32
    %c0_i32_1 = arith.constant 0 : i32
    return %c0_i32, %c0_i32_0 : i32, i32
  }
  func.func @transform_4(%arg0: i32) -> (i32, i32) {
    %c0_i32 = arith.constant 0 : i32
    %c0_i32_0 = arith.constant 0 : i32
    %c0_i32_1 = arith.constant 0 : i32
    return %c0_i32, %c0_i32_0 : i32, i32
  }
  func.func @transform_5(%arg0: i32) -> (i32, i32) {
    %c0_i32 = arith.constant 0 : i32
    %c0_i32_0 = arith.constant 0 : i32
    %c0_i32_1 = arith.constant 0 : i32
    return %c0_i32, %c0_i32_0 : i32, i32
  }
  func.func @transform_6(%arg0: i32) -> (i32, i32) {
    %c0_i32 = arith.constant 0 : i32
    %c0_i32_0 = arith.constant 0 : i32
    %c0_i32_1 = arith.constant 0 : i32
    return %c0_i32, %c0_i32_0 : i32, i32
  }
  func.func @transform_7(%arg0: i32) -> (i32, i32) {
    %c0_i32 = arith.constant 0 : i32
    %c0_i32_0 = arith.constant 0 : i32
    return %arg0, %c0_i32 : i32, i32
  }
}

</mosaic_0001>

<bundles_post_ra>
// kernel: tpu_custom_call.1
= control target key start
LH: loop header
LB: loop body
LE: loop exit
PB: predicated region body
PF: predicated region fallthrough
CT: control target
= control target key end

     0   :  { %12 = vsyncpa [#allocation3], 0  ;;  %s999_s0 = inlined_call_operand.vmem [shape: f32[16,32], index: 0, kind: input, shape index: {}]   ;;  %s1000_s1 = inlined_call_operand.vmem [shape: f32[1,32], index: 1, kind: input, shape index: {}]   ;;  %s1001_s2 = inlined_call_operand.vmem [shape: f32[1,32], index: 2, kind: input, shape index: {}]   ;;  %s1002_s3 = inlined_call_operand.vmem [shape: f32[32,128], index: 3, kind: input, shape index: {}]   ;;  %s1003_s4 = inlined_call_operand.vmem [shape: f32[1,128], index: 4, kind: input, shape index: {}]   ;;  %s1004_s5 = inlined_call_operand.vmem [shape: f32[128,32], index: 5, kind: input, shape index: {}]   ;;  %s1005_s6 = inlined_call_operand.vmem [shape: f32[1,32], index: 6, kind: input, shape index: {}]   ;;  %s1006_s7 = inlined_call_operand.hbm [shape: f32[16,32], index: 7, kind: output, shape index: {}]  }
   0x1   :  { %14 = vsyncpa [#allocation3 + $0x1], 0  ;;  %s823_s24 = smov 0   ;;  %s825_s25 = smov 0  }
   0x2   :  { %s827_s26 = smov 0   ;;  %s829_s27 = smov 0  }
   0x3 LB: > { %s844_s28 = sadd.s32 4294967295, %s777_s27   ;;  %s558_s29 = sadd.s32 4294967294, %s777_s27   ;;  %s777_s27 = sphi %s829_s27, %s1012_s27   ;;  %s773_s26 = sphi %s827_s26, %s1011_s26   ;;  %s769_s25 = sphi %s825_s25, %s1010_s25   ;;  %s765_s24 = sphi %s823_s24, %s1009_s24  }
   0x4   : > { %s848_s30 = sadd.s32 1, %s777_s27   ;;  %s179_s8 = sadd.s32 1, %s773_s26 }
   0x5   : > { %s176_s9 = ssub.s32 %s777_s27, %s848_s30  ;;  %p189_p0 = scmp.ne.s32.totalorder %s773_s26, %s769_s25 }
   0x6   : > { %p177_p1 = scmp.eq.s32.totalorder %s176_s9, 0  ;;  %p190_p2 = scmp.eq.s32.totalorder %s844_s28, 1 }
   0x7   : > { %p195_p3 = scmp.ne.s32.totalorder %s769_s25, %s765_s24  ;;  %p196_p4 = scmp.eq.s32.totalorder %s558_s29, 1 }
   0x8   : > { %s859_s10 = scalar_select %p177_p1, %s773_s26, %s179_s8  }
   0x9   : > { %p861_p5 = por %p190_p2, %p189_p0  ;;  %p865_p6 = por %p196_p4, %p195_p3 }
   0xa   : > { %p561_p7 = scmp.ge.s32.totalorder %s777_s27, 1  ;;  %p239_p8 = scmp.lt.s32.totalorder %s777_s27, 3 }
   0xc   : > { %p240_p9 = pnand %p561_p7, %p239_p8 }
   0xd   : > { %p270_p10 = scmp.lt.s32.totalorder (!%p240_p9), %s844_s28, 1  ;;  %vm275_vm0 = vcmask (!%p240_p9), 261120   ;;  %v306_v7 = vld [vmem:[%s1002_s3] sm:$0xff] (!%p240_p9)  ;;  %v307_v8 = vld [vmem:[%s1002_s3 + $0x8] sm:$0xff] (!%p240_p9)  ;;  %v308_v9 = vld [vmem:[%s1002_s3 + $0x10] sm:$0xff] (!%p240_p9)  ;;  %v779_v10 = vmov (!%p240_p9), 0.0|0.0  }
   0xe   : > { %243 = sbr.rel (%p240_p9) target bundleno = 783 (0x30f), region = 48  ;;  %641 = vmatprep.subr.bf16.mxu0 (!%p240_p9), %v779_v10  ;;  %v642_v11 = vpack.c.bf16 (!%p240_p9), %v307_v8, %v306_v7  ;;  %v309_v12 = vld [vmem:[%s1002_s3 + $0x18] sm:$0xff] (!%p240_p9)  ;;  %vm780_vm1 = vmmov (!%p240_p9), 0   ;;  %v781_v13 = vmov (!%p240_p9), 0.0   ;;  %647 = vmatprep.subr.bf16.mxu1 (!%p240_p9), %v779_v10  ;;  %v391_v15 = vld [vmem:[%s1004_s5] sm:$0xff] (!%p240_p9)  ;;  %v392_v16 = vld [vmem:[%s1004_s5 + $0x8] sm:$0xff] (!%p240_p9) }
   0xf   : > { %603 = vmatprep.mubr.msk.f32.mxu0 (!%p240_p9), %vm780_vm1, %v781_v13  ;;  %638 = vmatprep.mubr.msk.f32.mxu1 (!%p240_p9), %vm780_vm1, %v781_v13  ;;  %v645_v14 = vpack.c.bf16 (!%p240_p9), %v309_v12, %v308_v9  ;;  %v393_v17 = vld [vmem:[%s1004_s5 + $0x10] sm:$0xff] (!%p240_p9)  ;;  %v648_v18 = vpack.c.bf16 (!%p240_p9), %v392_v16, %v391_v15  ;;  %v394_v19 = vld [vmem:[%s1004_s5 + $0x18] sm:$0xff] (!%p240_p9)  ;;  %v395_v21 = vld [vmem:[%s1004_s5 + $0x20] sm:$0xff] (!%p240_p9)  ;;  %s267_s22 = sand.u32 (!%p240_p9), 1, %s769_s25   ;;  %s570_s9 = sshll.u32 (!%p240_p9), %s844_s28, 7 }
  0x10   : > { %643 = vmatpush3.bf16.msra.mxu0 (!%p240_p9), %v642_v11  ;;  %v651_v20 = vpack.c.bf16 (!%p240_p9), %v394_v19, %v393_v17  ;;  %v396_v22 = vld [vmem:[%s1004_s5 + $0x28] sm:$0xff] (!%p240_p9)  ;;  %v397_v24 = vld [vmem:[%s1004_s5 + $0x30] sm:$0xff] (!%p240_p9)  ;;  %v398_v25 = vld [vmem:[%s1004_s5 + $0x38] sm:$0xff] (!%p240_p9)  ;;  %s562_s23 = sshll.u32 (!%p240_p9), %s267_s22, 3  ;;  %s486_s18 = scalar_lea.sflag (!%p240_p9), [#allocation3], %s267_s22 }
  0x11   : > { %644 = vmatprep.subr.bf16.mxu0 (!%p240_p9), %v779_v10  ;;  %649 = vmatpush3.bf16.msra.mxu1 (!%p240_p9), %v648_v18  ;;  %v654_v23 = vpack.c.bf16 (!%p240_p9), %v396_v22, %v395_v21  ;;  %v657_v26 = vpack.c.bf16 (!%p240_p9), %v398_v25, %v397_v24  ;;  %v399_v27 = vld [vmem:[%s1004_s5 + $0x40] sm:$0xff] (!%p240_p9)  ;;  %v400_v28 = vld [vmem:[%s1004_s5 + $0x48] sm:$0xff] (!%p240_p9)  ;;  %v401_v30 = vld [vmem:[%s1004_s5 + $0x50] sm:$0xff] (!%p240_p9) }
  0x12   : > { %650 = vmatprep.subr.bf16.mxu1 (!%p240_p9), %v779_v10  ;;  %v660_v29 = vpack.c.bf16 (!%p240_p9), %v400_v28, %v399_v27  ;;  %v402_v31 = vld [vmem:[%s1004_s5 + $0x58] sm:$0xff] (!%p240_p9)  ;;  %v403_v33 = vld [vmem:[%s1004_s5 + $0x60] sm:$0xff] (!%p240_p9)  ;;  %v404_v34 = vld [vmem:[%s1004_s5 + $0x68] sm:$0xff] (!%p240_p9) }
  0x13   : > { %v663_v32 = vpack.c.bf16 (!%p240_p9), %v402_v31, %v401_v30  ;;  %v666_v35 = vpack.c.bf16 (!%p240_p9), %v404_v34, %v403_v33  ;;  %v564_v40 = vld [vmem:[%s1000_s1] ss:$0 sm:$0xff] (!%p240_p9)  ;;  %v405_v45 = vld [vmem:[%s1004_s5 + $0x70] sm:$0xff] (!%p240_p9)  ;;  %v406_v46 = vld [vmem:[%s1004_s5 + $0x78] sm:$0xff] (!%p240_p9) }
  0x14   : > { %646 = vmatpush3.bf16.msra.mxu0 (!%p240_p9), %v645_v14  ;;  %v565_v42 = vld [vmem:[%s1001_s2] ss:$0 sm:$0xff] (!%p240_p9)  ;;  %v669_v47 = vpack.c.bf16 (!%p240_p9), %v406_v46, %v405_v45 }
  0x15   : > { %s271_s13 = scalar_select %p270_p10, %s844_s28, 1  ;;  %652 = vmatpush3.bf16.msra.mxu1 %v651_v20  ;;  %v566_v48 = vld [vmem:[%s1003_s4] ss:$0 sm:$0xff] }
  0x16   : > { %653 = vmatprep.subr.bf16.mxu1 %v779_v10  ;;  %v568_v53 = vld [vmem:[%s1005_s6] ss:$0 sm:$0xff]  ;;  %s782_s28 = smov [#allocation2]  }
  0x17   : > { %s563_s14 = sshll.u32 %s271_s13, 3  ;;  %s269_s13 = scalar_lea.vmem [#allocation2], %s562_s23 }
  0x18   : > { %s273_s17 = scalar_lea.vmem %s999_s0, %s563_s14  ;;  %s499_s14 = sshll.u32 %s269_s13, 4  ;;  %s958_s14 = int_to_ptr.vmem [resolvable:$true] %s499_s14 }
  0x19   : > { %v274_v0 = vld [vmem:[%s273_s17] sm:$0xff]  ;;  %655 = vmatpush3.bf16.msra.mxu1 %v654_v23  ;;  %s956_s17 = scalar_lea.hbm %s1006_s7, %s570_s9  ;;  %s715_s19 = scalar_lea.vmem %s958_s14, 128 }
  0x1a   : > { %v276_v1 = vsel %vm275_vm0, %v274_v0, 0.0  ;;  %656 = vmatprep.subr.bf16.mxu1 %v779_v10  ;;  %p716_p11 = scmp.ne.s32.totalorder %s958_s14, %s715_s19  ;;  %s719_s20 = sshll.u32 %s782_s28, 4  ;;  %s720_s20 = int_to_ptr.vmem [resolvable:$false] %s719_s20 }
  0x1b   : > { %277 = vadd.xlane.f32.xlu0 %v276_v1  ;;  %s721_s21 = scalar_lea.vmem %s720_s20, 256  ;;  %p722_p0 = scmp.lt.s32.totalorder %s958_s14, %s720_s20 }
  0x1c   : > { %p717_p12 = pnand %p716_p11, %p861_p5  ;;  %p723_p1 = scmp.lt.s32.totalorder %s721_s21, %s715_s19 }
  0x1d   : > { %658 = vmatpush3.bf16.msra.mxu1 %v657_v26 }
  0x1e   : > { %659 = vmatprep.subr.bf16.mxu1 %v779_v10  ;;  %p718_p13 = pneg %p717_p12  ;;  %p724_p2 = por %p723_p1, %p722_p0 }
  0x20   : > { %p725_p3 = pnand %p724_p2, %p718_p13 }
  0x21   : > { %661 = vmatpush3.bf16.msra.mxu1 %v660_v29 }
  0x22   : > { %662 = vmatprep.subr.bf16.mxu1 %v779_v10 }
  0x25   : > { %664 = vmatpush3.bf16.msra.mxu1 %v663_v32 }
  0x26   : > { %665 = vmatprep.subr.bf16.mxu1 %v779_v10 }
  0x29   : > { %667 = vmatpush3.bf16.msra.mxu1 %v666_v35 }
  0x2a   : > { %668 = vmatprep.subr.bf16.mxu1 %v779_v10 }
  0x2d   : > { %670 = vmatpush3.bf16.msra.mxu1 %v669_v47 }
  0xa8   : > { %v278_v2 = vpop.xlane.xlu0 %277 }
  0xa9   : > { %v280_v3 = vmul.f32 0.03125, %v278_v2 }
  0xab   : > { %v281_v4 = vsub.f32 %v274_v0, %v280_v3 }
  0xad   : > { %v282_v5 = vmul.f32 %v281_v4, %v281_v4 }
  0xaf   : > { %v283_v6 = vsel %vm275_vm0, %v282_v5, 0.0 }
  0xb0   : > { %284 = vadd.xlane.f32.xlu0 %v283_v6 }
 0x13d   : > { %v285_v36 = vpop.xlane.xlu0 %284 }
 0x13e   : > { %v286_v37 = vmul.f32 0.03125, %v285_v36 }
 0x140   : > { %v287_v38 = vadd.f32 1e-05, %v286_v37 }
 0x142   : > { %713 = vrsqrt.f32 %v287_v38 }
 0x14c   : > { %v714_v39 = vpop.eup %713 }
 0x14d   : > { %v289_v41 = vmul.f32 %v714_v39, %v281_v4 }
 0x14f   : > { %v297_v43 = vmul.f32 %v564_v40, %v289_v41 }
 0x151   : > { %v305_v44 = vadd.f32 %v565_v42, %v297_v43 }
 0x153   : > { %604 = vmatmul.mubr.msk.f32.vlgmr.msra.gmra.mrb[0].mxu0 %vm275_vm0, %v305_v44 }
 0x226   : > { %v386_v49 = vpop.f32.mrb[0].mxu0 }
 0x227   : > { %v387_v50 = vadd.f32 %v566_v48, %v386_v49  ;;  %v605_v51 = vpop.f32.mrb[1].mxu0 }
 0x229   : > { %v390_v52 = vmax.f32 %v387_v50, 0.0 }
 0x22b   : > { %639 = vmatmul.mubr.f32.vlgmr.msra.gmra.mrb[0].mxu1 %v390_v52 }
 0x2fe   : > { %v480_v54 = vpop.f32.mrb[0].mxu1 }
 0x2ff   : > { %v481_v55 = vadd.f32 %v568_v53, %v480_v54  ;;  %v640_v56 = vpop.f32.mrb[1].mxu1 }
 0x301   : > { %484 = vst.msk [vmem:[%s269_s13] sm:$0xff] %vm275_vm0, %v481_v55 }
 0x302   : > { %728 = shalt.err (!%p725_p3)
}
 0x303   : > { %s729_s22 = scalar_lea.hbm %s956_s17, 128  ;;  %s733_s8 = scalar_lea.hbm %s1006_s7, 256 }
 0x304   : > { %p730_p4 = scmp.ne.s32.totalorder %s956_s17, %s729_s22  ;;  %p734_p9 = scmp.lt.u32.totalorder %s956_s17, %s1006_s7 }
 0x305   : > { %p735_p10 = scmp.lt.u32.totalorder %s733_s8, %s729_s22  ;;  %p737_p12 = scmp.lt.u32.totalorder %s729_s22, %s956_s17 }
 0x306   : > { %p731_p7 = pnand %p730_p4, %p861_p5 }
 0x307   : > { %p736_p11 = por %p735_p10, %p734_p9 }
 0x308   : > { %p732_p8 = pneg %p731_p7 }
 0x309   : > { %p738_p13 = por %p737_p12, %p736_p11 }
 0x30b   : > { %p739_p0 = pnand %p738_p13, %p732_p8 }
 0x30d   : > { %742 = shalt.err (!%p739_p0)
}
 0x30e   : > { %671 = dma.vmem_to_hbm [thread:$0]  (%p861_p5), %s958_s14, 128, %s956_s17, %s486_s18  }
 0x30f PF: > { %p677_p1 = scmp.ge.s32.totalorder %s777_s27, 2  ;;  %s511_s15 = sand.u32 1, %s765_s24  }
 0x310   : > { %s512_s16 = scalar_lea.sflag [#allocation3], %s511_s15 }
 0x311   : > { %p674_p2 = pnand %p677_p1, %p865_p6 }
 0x313   : > { %760 = dma.done.wait (!%p674_p2), %s512_s16, 128  }
 0x314   : > { %762 = vsyncadd (!%p674_p2), %s512_s16, 4294967168  ;;  %p17_p3 = scmp.ge.s32.totalorder %s848_s30, 4   ;;  %s1009_s24 = smov %s769_s25 }
 0x315   : > { %s1010_s25 = smov %s773_s26  ;;  %s1011_s26 = smov %s859_s10 }
 0x316   : > { %s1012_s27 = smov %s848_s30  ;;  %19 = sbr.rel (!%p17_p3) target bundleno = 3 (0x3), region = 83 }
 0x31d   :  { %517 = vsyncpa [#allocation3], 1 }
 0x31e   :  { %519 = vsyncpa [#allocation3 + $0x1], 1 }

</bundles_post_ra>
